<compile_context>
chip_gen: v6e
topology: v6e:2x2x1
jax: 0.10.0
libtpu: 0.0.40
codegen_flags: <defaults>
</compile_context>

<pallas_src>
import functools

import jax
import jax.numpy as jnp
from jax.experimental import pallas as pl
from jax.experimental.pallas import tpu as pltpu


def _round_up(x: int, m: int) -> int:
    return ((x + m - 1) // m) * m


def _classifier_kernel(x_ref, w_ref, b_ref, logits_ref, probs_ref):
    # Linear head on the MXU (f32 accumulation regardless of input dtype).
    raw = jnp.dot(x_ref[...], w_ref[...],
                  preferred_element_type=jnp.float32) + b_ref[...]

    # Categorical(logits=raw) semantics (numerically stable):
    #   logits = raw - logsumexp(raw, -1, keepdims=True)
    #   probs  = exp(logits)             (== softmax(raw, -1))
    # Padded class columns carry bias = -1e30 so exp() underflows to exactly 0
    # and they never perturb the max / sum over the real classes.
    m = jnp.max(raw, axis=-1, keepdims=True)
    shifted = raw - m
    log_z = jnp.log(jnp.sum(jnp.exp(shifted), axis=-1, keepdims=True))
    norm_logits = shifted - log_z

    logits_ref[...] = norm_logits.astype(logits_ref.dtype)
    # EUP exp of the already-normalized logits: no reciprocal, no extra VPU mul.
    probs_ref[...] = jnp.exp(norm_logits).astype(probs_ref.dtype)


@functools.partial(jax.jit, static_argnames=("use_bf16",))
def classifier_forward(x, w, b, *, use_bf16=False):
    """Forward of Classifier(model=Linear(D, C)).

    Args:
      x: [B, D] input features.
      w: [D, C] linear weight (nn.Linear weight, pre-transposed).
      b: [C]   linear bias.
      use_bf16: cast x/W to bf16 for the MXU fast path (use at large D/C).

    Returns:
      (logits, probs): the `.logits` and `.probs` fields of
      Categorical(logits = x @ w + b), each [B, C] float32.
    """
    B, D = x.shape
    Dw, C = w.shape
    assert D == Dw and b.shape == (C,)

    # ---- lane/sublane padding so every load/store is unmasked -------------
    LANE, SUBLANE = 128, 8
    Dp = _round_up(D, LANE)          # K dim: aligned MXU depth, lane-dense x loads
    Cp = _round_up(C, LANE)          # class dim: lane-dense output stores
    B8 = _round_up(B, SUBLANE)
    TB = min(256, B8)                # rows per grid step (256 ~ HBM-roofline tile)
    Bp = _round_up(B, TB)
    nb = Bp // TB

    in_dtype = jnp.bfloat16 if use_bf16 else jnp.float32
    x_p = jnp.zeros((Bp, Dp), in_dtype).at[:B, :D].set(x.astype(in_dtype))
    w_p = jnp.zeros((Dp, Cp), in_dtype).at[:D, :C].set(w.astype(in_dtype))
    # Padded classes get a huge negative bias -> softmax weight exactly 0.
    b_p = jnp.full((1, Cp), -1e30, jnp.float32).at[:, :C].set(
        b.reshape(1, C).astype(jnp.float32))

    # ---- VMEM budget (v7x: 64 MiB physical / 32 MiB scoped default) -------
    isz = jnp.dtype(in_dtype).itemsize
    vmem_est = (2 * TB * Dp * isz          # double-buffered x tile
                + Dp * Cp * isz            # resident W
                + Cp * 4                   # resident bias
                + 2 * 2 * TB * Cp * 4)     # double-buffered logits + probs tiles
    vmem_limit = int(min(max(2 * vmem_est, 1 << 20), 64 * 1024 * 1024))

    out_shapes = (
        jax.ShapeDtypeStruct((Bp, Cp), jnp.float32),   # Categorical.logits (padded)
        jax.ShapeDtypeStruct((Bp, Cp), jnp.float32),   # Categorical.probs  (padded)
    )

    logits_pad, probs_pad = pl.pallas_call(
        _classifier_kernel,
        out_shape=out_shapes,
        grid_spec=pltpu.PrefetchScalarGridSpec(
            num_scalar_prefetch=0,
            grid=(nb,),
            in_specs=[
                pl.BlockSpec((TB, Dp), lambda i: (i, 0)),   # streamed x rows
                pl.BlockSpec((Dp, Cp), lambda i: (0, 0)),   # resident W
                pl.BlockSpec((1, Cp), lambda i: (0, 0)),    # resident bias
            ],
            out_specs=[
                pl.BlockSpec((TB, Cp), lambda i: (i, 0)),
                pl.BlockSpec((TB, Cp), lambda i: (i, 0)),
            ],
        ),
        compiler_params=pltpu.CompilerParams(
            dimension_semantics=("parallel",),   # megacore-shardable batch axis
            vmem_limit_bytes=vmem_limit,
        ),
    )(x_p, w_p, b_p)

    # Strip padding outside the kernel (cheap XLA slice).
    return logits_pad[:B, :C], probs_pad[:B, :C]


if __name__ == "__main__":
    # Small, deterministic setup: batch=8, hidden=32, num_classes=8.
    B, D, C = 8, 32, 8
    key = jax.random.PRNGKey(0)
    kx, kw, kb = jax.random.split(key, 3)

    x = jax.random.normal(kx, (B, D), dtype=jnp.float32)
    # Deterministic "nn.Linear(D, C)" parameters (weight stored transposed: [D, C]).
    w = jax.random.normal(kw, (D, C), dtype=jnp.float32) * (1.0 / jnp.sqrt(D))
    b = jax.random.normal(kb, (C,), dtype=jnp.float32) * 0.01

    logits, probs = classifier_forward(x, w, b)
    jax.block_until_ready((logits, probs))

    # Reference check in plain JAX (Categorical semantics).
    raw = x @ w + b
    ref_logits = raw - jax.scipy.special.logsumexp(raw, axis=-1, keepdims=True)
    ref_probs = jax.nn.softmax(raw, axis=-1)
    assert logits.shape == (B, C) and probs.shape == (B, C)
    assert jnp.allclose(logits, ref_logits, atol=1e-5, rtol=1e-5)
    assert jnp.allclose(probs, ref_probs, atol=1e-5, rtol=1e-5)
    assert jnp.allclose(jnp.sum(probs, axis=-1), 1.0, atol=1e-5)

    # TODO(synk): Classifier.score (sklearn top_k_accuracy) and the Categorical
    # object itself stay host-side; the kernel returns its .logits/.probs tensors.
    print("KERNEL_OK")
</pallas_src>

<mosaic_0001>
module attributes {stable_mosaic.version = 11 : i64} {
  func.func @_classifier_kernel(%arg0: i32, %arg1: memref<8x128xf32, #tpu.memory_space<vmem>>, %arg2: memref<128x128xf32, #tpu.memory_space<vmem>>, %arg3: memref<1x128xf32, #tpu.memory_space<vmem>>, %arg4: memref<8x128xf32, #tpu.memory_space<vmem>>, %arg5: memref<8x128xf32, #tpu.memory_space<vmem>>) attributes {dimension_semantics = [#tpu.dimension_semantics<parallel>], iteration_bounds = array<i64: 1>, scalar_prefetch = 0 : i64, scratch_operands = 0 : i64, tpu.core_type = #tpu.core_type<tc>, window_params = [{transform_indices = @transform_0, window_bounds = array<i64: 8, 128>}, {pipeline_mode = #tpu.pipeline_mode<synchronous>, transform_indices = @transform_1, window_bounds = array<i64: 128, 128>}, {pipeline_mode = #tpu.pipeline_mode<synchronous>, transform_indices = @transform_2, window_bounds = array<i64: 1, 128>}, {transform_indices = @transform_3, window_bounds = array<i64: 8, 128>}, {transform_indices = @transform_4, window_bounds = array<i64: 8, 128>}]} {
    %c0 = arith.constant 0 : index
    %c0_0 = arith.constant 0 : index
    %0 = vector.load %arg1[%c0, %c0_0] : memref<8x128xf32, #tpu.memory_space<vmem>>, vector<8x128xf32>
    %c0_1 = arith.constant 0 : index
    %c0_2 = arith.constant 0 : index
    %1 = vector.load %arg2[%c0_1, %c0_2] : memref<128x128xf32, #tpu.memory_space<vmem>>, vector<128x128xf32>
    %cst = arith.constant dense<0.000000e+00> : vector<8x128xf32>
    %2 = tpu.matmul %0, %1, %cst {dimension_numbers = #tpu.dot_dimension_numbers<[1], [0], [0], [1], [0, 0, 1, 1], [], []>} : vector<8x128xf32>, vector<128x128xf32>, vector<8x128xf32> -> vector<8x128xf32>
    %c0_3 = arith.constant 0 : index
    %c0_4 = arith.constant 0 : index
    %3 = vector.load %arg3[%c0_3, %c0_4] : memref<1x128xf32, #tpu.memory_space<vmem>>, vector<1x128xf32>
    %4 = vector.broadcast %3 : vector<1x128xf32> to vector<8x128xf32>
    %5 = arith.addf %2, %4 : vector<8x128xf32>
    %cst_5 = arith.constant dense<0xFF800000> : vector<8xf32>
    %6 = vector.multi_reduction <maximumf>, %5, %cst_5 [1] : vector<8x128xf32> to vector<8xf32>
    %7 = vector.shape_cast %6 : vector<8xf32> to vector<8x1xf32>
    %8 = vector.broadcast %7 : vector<8x1xf32> to vector<8x128xf32>
    %9 = arith.subf %5, %8 : vector<8x128xf32>
    %10 = math.exp %9 : vector<8x128xf32>
    %cst_6 = arith.constant dense<0.000000e+00> : vector<8xf32>
    %11 = vector.multi_reduction <add>, %10, %cst_6 [1] : vector<8x128xf32> to vector<8xf32>
    %12 = vector.shape_cast %11 : vector<8xf32> to vector<8x1xf32>
    %13 = math.log %12 : vector<8x1xf32>
    %14 = vector.broadcast %13 : vector<8x1xf32> to vector<8x128xf32>
    %15 = arith.subf %9, %14 : vector<8x128xf32>
    %c0_7 = arith.constant 0 : index
    %c0_8 = arith.constant 0 : index
    %16 = vector.load %arg4[%c0_7, %c0_8] : memref<8x128xf32, #tpu.memory_space<vmem>>, vector<8x128xf32>
    tpu.vector_store %arg4[%c0_7, %c0_8], %15 {strides = array<i32>} : memref<8x128xf32, #tpu.memory_space<vmem>>, vector<8x128xf32>,
    %17 = math.exp %15 : vector<8x128xf32>
    %c0_9 = arith.constant 0 : index
    %c0_10 = arith.constant 0 : index
    %18 = vector.load %arg5[%c0_9, %c0_10] : memref<8x128xf32, #tpu.memory_space<vmem>>, vector<8x128xf32>
    tpu.vector_store %arg5[%c0_9, %c0_10], %17 {strides = array<i32>} : memref<8x128xf32, #tpu.memory_space<vmem>>, vector<8x128xf32>,
    return
  }
  func.func @transform_0(%arg0: i32) -> (i32, i32) {
    %c0_i32 = arith.constant 0 : i32
    %c0_i32_0 = arith.constant 0 : i32
    return %arg0, %c0_i32 : i32, i32
  }
  func.func @transform_1(%arg0: i32) -> (i32, i32) {
    %c0_i32 = arith.constant 0 : i32
    %c0_i32_0 = arith.constant 0 : i32
    %c0_i32_1 = arith.constant 0 : i32
    return %c0_i32, %c0_i32_0 : i32, i32
  }
  func.func @transform_2(%arg0: i32) -> (i32, i32) {
    %c0_i32 = arith.constant 0 : i32
    %c0_i32_0 = arith.constant 0 : i32
    %c0_i32_1 = arith.constant 0 : i32
    return %c0_i32, %c0_i32_0 : i32, i32
  }
  func.func @transform_3(%arg0: i32) -> (i32, i32) {
    %c0_i32 = arith.constant 0 : i32
    %c0_i32_0 = arith.constant 0 : i32
    return %arg0, %c0_i32 : i32, i32
  }
  func.func @transform_4(%arg0: i32) -> (i32, i32) {
    %c0_i32 = arith.constant 0 : i32
    %c0_i32_0 = arith.constant 0 : i32
    return %arg0, %c0_i32 : i32, i32
  }
}

</mosaic_0001>

<bundles_post_ra>
// kernel: classifier_forward.1
= control target key start
LH: loop header
LB: loop body
LE: loop exit
PB: predicated region body
PF: predicated region fallthrough
CT: control target
= control target key end

     0   :  { %10 = vsyncpa [#allocation3], 0  ;;  %v261_v1 = vmov 0.0   ;;  %vm262_vm0 = vmmov 0   ;;  %s350_s0 = inlined_call_operand.vmem [shape: f32[8,128], index: 0, kind: input, shape index: {}]   ;;  %s351_s1 = inlined_call_operand.vmem [shape: f32[128,128], index: 1, kind: input, shape index: {}]   ;;  %s352_s2 = inlined_call_operand.vmem [shape: f32[1,128], index: 2, kind: input, shape index: {}]   ;;  %s353_s3 = inlined_call_operand.hbm [shape: f32[8,128], index: 3, kind: output, shape index: {0}]   ;;  %s354_s4 = inlined_call_operand.hbm [shape: f32[8,128], index: 4, kind: output, shape index: {1}]  }
   0x1   :  { %v34_v0 = vld [vmem:[%s351_s1 + $0x78] sm:$0xff]  ;;  %172 = vmatprep.subr.mxu0 %v261_v1  ;;  %v33_v2 = vld [vmem:[%s351_s1 + $0x70] sm:$0xff]  ;;  %204 = vmatprep.mubr.msk.f32.mxu0 %vm262_vm0, %v261_v1  ;;  %v32_v3 = vld [vmem:[%s351_s1 + $0x68] sm:$0xff] }
   0x2   :  { %173 = vmatpush3.msra.mxu0 %v34_v0  ;;  %v31_v4 = vld [vmem:[%s351_s1 + $0x60] sm:$0xff] }
   0x3   :  { %174 = vmatprep.subr.mxu0 %v261_v1 }
   0x4   :  { %175 = vmatpush3.msra.mxu0 %v33_v2 }
   0x5   :  { %176 = vmatprep.subr.mxu0 %v261_v1 }
   0x6   :  { %177 = vmatpush3.msra.mxu0 %v32_v3 }
   0x7   :  { %11 = vsyncpa [#allocation5], 0  ;;  %178 = vmatprep.subr.mxu0 %v261_v1  ;;  %v30_v5 = vld [vmem:[%s351_s1 + $0x58] sm:$0xff]  ;;  %v29_v6 = vld [vmem:[%s351_s1 + $0x50] sm:$0xff] }
   0x8   :  { %179 = vmatpush3.msra.mxu0 %v31_v4  ;;  %v28_v7 = vld [vmem:[%s351_s1 + $0x48] sm:$0xff]  ;;  %v27_v8 = vld [vmem:[%s351_s1 + $0x40] sm:$0xff]  ;;  %v26_v9 = vld [vmem:[%s351_s1 + $0x38] sm:$0xff] }
   0x9   :  { %180 = vmatprep.subr.mxu0 %v261_v1  ;;  %v25_v10 = vld [vmem:[%s351_s1 + $0x30] sm:$0xff]  ;;  %v24_v11 = vld [vmem:[%s351_s1 + $0x28] sm:$0xff]  ;;  %v23_v12 = vld [vmem:[%s351_s1 + $0x20] sm:$0xff] }
   0xa   :  { %181 = vmatpush3.msra.mxu0 %v30_v5  ;;  %v22_v13 = vld [vmem:[%s351_s1 + $0x18] sm:$0xff]  ;;  %v21_v14 = vld [vmem:[%s351_s1 + $0x10] sm:$0xff]  ;;  %v20_v15 = vld [vmem:[%s351_s1 + $0x8] sm:$0xff] }
   0xb   :  { %182 = vmatprep.subr.mxu0 %v261_v1  ;;  %v19_v16 = vld [vmem:[%s351_s1] sm:$0xff] }
   0xc   :  { %183 = vmatpush3.msra.mxu0 %v29_v6  ;;  %v18_v17 = vld [vmem:[%s350_s0] sm:$0xff]  ;;  %s263_s0 = smov [#allocation2]  }
   0xd   :  { %184 = vmatprep.subr.mxu0 %v261_v1  ;;  %v154_v18 = vld [vmem:[%s352_s2] ss:$0 sm:$0xff]  ;;  %s132_s1 = sshll.u32 %s263_s0, 4  ;;  %s133_s1 = int_to_ptr.vmem [resolvable:$true] %s132_s1 }
   0xe   :  { %185 = vmatpush3.msra.mxu0 %v28_v7  ;;  %s217_s2 = scalar_lea.vmem %s133_s1, 128  ;;  %p222_p1 = scmp.lt.s32.totalorder %s133_s1, %s133_s1 }
   0xf   :  { %186 = vmatprep.subr.mxu0 %v261_v1  ;;  %p218_p0 = scmp.ne.s32.totalorder %s133_s1, %s217_s2  ;;  %p223_p2 = scmp.lt.s32.totalorder %s217_s2, %s217_s2 }
  0x10   :  { %187 = vmatpush3.msra.mxu0 %v27_v8 }
  0x11   :  { %188 = vmatprep.subr.mxu0 %v261_v1  ;;  %p224_p3 = por %p223_p2, %p222_p1 }
  0x12   :  { %189 = vmatpush3.msra.mxu0 %v26_v9 }
  0x13   :  { %190 = vmatprep.subr.mxu0 %v261_v1  ;;  %p225_p4 = pnand %p224_p3, %p218_p0 }
  0x14   :  { %191 = vmatpush3.msra.mxu0 %v25_v10 }
  0x15   :  { %192 = vmatprep.subr.mxu0 %v261_v1 }
  0x16   :  { %193 = vmatpush3.msra.mxu0 %v24_v11 }
  0x17   :  { %194 = vmatprep.subr.mxu0 %v261_v1 }
  0x18   :  { %195 = vmatpush3.msra.mxu0 %v23_v12 }
  0x19   :  { %196 = vmatprep.subr.mxu0 %v261_v1 }
  0x1a   :  { %197 = vmatpush3.msra.mxu0 %v22_v13 }
  0x1b   :  { %198 = vmatprep.subr.mxu0 %v261_v1 }
  0x1c   :  { %199 = vmatpush3.msra.mxu0 %v21_v14 }
  0x1d   :  { %200 = vmatprep.subr.mxu0 %v261_v1 }
  0x1e   :  { %201 = vmatpush3.msra.mxu0 %v20_v15 }
  0x1f   :  { %202 = vmatprep.subr.mxu0 %v261_v1 }
  0x20   :  { %203 = vmatpush3.msra.mxu0 %v19_v16 }
  0x21   :  { %205 = vmatmul.mubr.f32.vlgmr.msra.gmra.mxu0 %v18_v17 }
  0xe1   :  { %v108_v19 = vpop.f32.mrf.mxu0 }
  0xe2   :  { %v109_v20 = vadd.f32 %v154_v18, %v108_v19 }
  0xe3   :  { %v206_v21 = vpop.f32.mrf.mxu0 }
  0xe4   :  { %112 = vmax.xlane.f32.xlu0 %v109_v20 }
 0x16d   :  { %v113_v22 = vpop.xlane.xlu0 %112 }
 0x16e   :  { %v114_v23 = vsub.f32 %v109_v20, %v113_v22 }
 0x170   :  { %v115_v24 = vmul.f32 1.442695, %v114_v23 }
 0x172   :  { %211 = vpow2.f32 %v115_v24 }
 0x17f   :  { %v212_v25 = vpop.eup %211 }
 0x180   :  { %117 = vadd.xlane.f32.xlu0 %v212_v25 }
 0x209   :  { %v118_v26 = vpop.xlane.xlu0 %117 }
 0x20a   :  { %213 = vlog2.f32 %v118_v26 }
 0x217   :  { %v214_v27 = vpop.eup %213 }
 0x218   :  { %v120_v28 = vmul.f32 0.6931472, %v214_v27 }
 0x21a   :  { %v121_v29 = vsub.f32 %v114_v23, %v120_v28 }
 0x21c   :  { %122 = vst [vmem:[#allocation2] sm:$0xff] %v121_v29  ;;  %v123_v30 = vmul.f32 1.442695, %v121_v29 }
 0x21d   :  { %228 = shalt.err (!%p225_p4)
}
 0x21e   :  { %135 = dma.vmem_to_hbm [thread:$0]  %s133_s1, 128, %s353_s3, [#allocation3]   ;;  %215 = vpow2.f32 %v123_v30 }
 0x21f   :  { %s264_s27 = smov [#allocation4]  }
 0x220   :  { %s142_s28 = sshll.u32 %s264_s27, 4  ;;  %s143_s28 = int_to_ptr.vmem [resolvable:$true] %s142_s28 }
 0x221   :  { %s237_s29 = scalar_lea.vmem %s143_s28, 128  ;;  %p242_p6 = scmp.lt.s32.totalorder %s143_s28, %s143_s28 }
 0x222   :  { %p238_p5 = scmp.ne.s32.totalorder %s143_s28, %s237_s29  ;;  %p243_p7 = scmp.lt.s32.totalorder %s237_s29, %s237_s29 }
 0x224   :  { %p244_p8 = por %p243_p7, %p242_p6 }
 0x226   :  { %p245_p9 = pnand %p244_p8, %p238_p5 }
 0x22b   :  { %v216_v31 = vpop.eup %215 }
 0x22c   :  { %125 = vst [vmem:[#allocation4] sm:$0xff] %v216_v31 }
 0x22d   :  { %248 = shalt.err (!%p245_p9)
}
 0x22e   :  { %145 = dma.vmem_to_hbm [thread:$0]  %s143_s28, 128, %s354_s4, [#allocation5]  }
 0x22f   :  { %257 = dma.done.wait [#allocation3], 128  }
 0x230   :  { %258 = vsyncadd [#allocation3], 4294967168 }
 0x231   :  { %259 = dma.done.wait [#allocation5], 128  }
 0x232   :  { %260 = vsyncadd [#allocation5], 4294967168 }
 0x233   :  { %152 = vsyncpa [#allocation3], 1 }
 0x234   :  { %153 = vsyncpa [#allocation5], 1 }

</bundles_post_ra>
